<compile_context>
chip_gen: v5e
topology: v5e:2x2
jax: 0.10.0
libtpu: 0.0.40
codegen_flags: <defaults>
</compile_context>

<pallas_src>
import jax
import jax.numpy as jnp
from jax.experimental import pallas as pl
from jax.experimental.pallas import tpu as pltpu


def _embed_kernel(idx_ref, table_ref, out_ref):
    # idx_ref   : (TNp, pack) int32  -- type ids, pre-offset by slot*num_types
    # table_ref : (pack*num_types, pack*emb_dim) -- block-diagonal replicated
    #             embedding table (slot s rows feed slot s output columns only)
    # out_ref   : (TNp, pack*emb_dim)  -- lane-dense packed output block
    tnp, pack = idx_ref.shape
    kdim = table_ref.shape[0]  # pack * num_types

    col = jax.lax.broadcasted_iota(jnp.int32, (tnp, kdim), 1)
    onehot = jnp.zeros((tnp, kdim), dtype=table_ref.dtype)
    for s in range(pack):  # static, tiny loop (pack = 128 // emb_dim, >= 1)
        onehot = onehot + (idx_ref[:, s : s + 1] == col).astype(table_ref.dtype)

    # Exact row selection via MXU matmul, f32 accumulation.
    out_ref[...] = jnp.dot(
        onehot, table_ref[...], preferred_element_type=jnp.float32
    ).astype(out_ref.dtype)


def type_dict_node_encoder(x, table, *, tile_nodes=512):
    """Pallas implementation of TypeDictNodeEncoder.forward.

    Args:
      x:     [N, F] integer node feature matrix (column 0 holds the type id).
      table: [num_types, emb_dim] embedding weight (f32 or bf16).
      tile_nodes: nodes per grid step (keep it a multiple of 128; 256-1024
        recommended -- big enough to hide per-step overhead, small enough to
        leave >= 2 grid steps for v7x megacore sharding).
    Returns:
      [N, emb_dim] embedded node features (same dtype as `table`).
    """
    n = x.shape[0]
    num_types, emb_dim = table.shape

    # Lane packing: put `pack` consecutive nodes into one 128-lane output row
    # so the output block's last dim is >= 128 (unmasked full-width stores).
    if emb_dim < 128 and 128 % emb_dim == 0:
        pack = 128 // emb_dim
    else:
        pack = 1
    if tile_nodes % pack != 0 or (tile_nodes // pack) % 8 != 0:
        pack = 1  # fall back to the unpacked layout for odd configurations
    assert tile_nodes % 8 == 0, "tile_nodes must be sublane (8) aligned"
    tnp = tile_nodes // pack  # packed rows per tile (matmul M dimension)

    # ---- host-side glue (plain JAX) ------------------------------------
    idx = x[:, 0].astype(jnp.int32)
    # Out-of-range ids are clamped (PyTorch nn.Embedding would raise).
    idx = jnp.clip(idx, 0, num_types - 1)
    # Pad ragged node counts up to a whole number of tiles (type-0 padding;
    # padded rows are sliced off below).
    n_pad = pl.cdiv(n, tile_nodes) * tile_nodes
    idx = jnp.pad(idx, (0, n_pad - n))
    # Offset every packing slot so one packed one-hot row selects from the
    # matching block of the block-diagonal replicated table.
    idx_packed = idx.reshape(n_pad // pack, pack) + (
        jnp.arange(pack, dtype=jnp.int32) * num_types
    )

    # Block-diagonal replicated table:
    #   table_packed[s*num_types + t, p*emb_dim + e] = (s == p) * table[t, e]
    eye = jnp.eye(pack, dtype=table.dtype)
    table_packed = jnp.einsum("sp,te->stpe", eye, table).reshape(
        pack * num_types, pack * emb_dim
    )

    grid = (n_pad // tile_nodes,)
    out_packed = pl.pallas_call(
        _embed_kernel,
        out_shape=jax.ShapeDtypeStruct((n_pad // pack, pack * emb_dim), table.dtype),
        grid_spec=pltpu.PrefetchScalarGridSpec(
            num_scalar_prefetch=0,
            grid=grid,
            in_specs=[
                pl.BlockSpec((tnp, pack), lambda i: (i, 0)),
                # Constant (small) table block; double-buffering cost is
                # negligible for a type dictionary.
                pl.BlockSpec((pack * num_types, pack * emb_dim), lambda i: (0, 0)),
            ],
            out_specs=pl.BlockSpec((tnp, pack * emb_dim), lambda i: (i, 0)),
        ),
        compiler_params=pltpu.CompilerParams(
            dimension_semantics=("parallel",),  # shards across TCs on v7x
        ),
    )(idx_packed, table_packed)

    # Free row-major un-packing reshape, then drop the padded tail.
    return out_packed.reshape(n_pad, emb_dim)[:n]


if __name__ == "__main__":
    # Small, deterministic example consistent with the module:
    #   cfg.dataset.node_encoder_num_types = 8, emb_dim = 32
    #   batch.x : [N, F] integer node features; N is ragged on purpose to
    #   exercise the padded final tile (2000 -> 4 grid steps of 512 nodes).
    num_types = 8
    emb_dim = 32
    n_nodes = 2000
    n_feats = 3

    key = jax.random.PRNGKey(0)
    k_w, k_x = jax.random.split(key)

    # Deterministic parameter init (nn.Embedding default is N(0, 1)).
    table = jax.random.normal(k_w, (num_types, emb_dim), dtype=jnp.float32)

    # Integer node features in [0, num_types).
    x = jax.random.randint(k_x, (n_nodes, n_feats), 0, num_types, dtype=jnp.int32)

    out = type_dict_node_encoder(x, table)
    out = jax.block_until_ready(out)

    # Reference check (plain JAX gather == nn.Embedding lookup).
    ref = table[x[:, 0]]
    assert out.shape == (n_nodes, emb_dim)
    assert jnp.allclose(out, ref, atol=1e-6), "mismatch vs reference embedding"

    print("KERNEL_OK")
</pallas_src>

<mosaic_0001>
module attributes {stable_mosaic.version = 11 : i64} {
  func.func @_embed_kernel(%arg0: i32, %arg1: memref<128x4xi32, #tpu.memory_space<vmem>>, %arg2: memref<32x128xf32, #tpu.memory_space<vmem>>, %arg3: memref<128x128xf32, #tpu.memory_space<vmem>>) attributes {dimension_semantics = [#tpu.dimension_semantics<parallel>], iteration_bounds = array<i64: 4>, scalar_prefetch = 0 : i64, scratch_operands = 0 : i64, tpu.core_type = #tpu.core_type<tc>, window_params = [{transform_indices = @transform_0, window_bounds = array<i64: 128, 4>}, {pipeline_mode = #tpu.pipeline_mode<synchronous>, transform_indices = @transform_1, window_bounds = array<i64: 32, 128>}, {transform_indices = @transform_2, window_bounds = array<i64: 128, 128>}]} {
    %0 = tpu.iota {dimensions = array<i32: 1>} : vector<128x32xi32>
    %cst = arith.constant 0.000000e+00 : f32
    %1 = vector.broadcast %cst : f32 to vector<128x32xf32>
    %c0 = arith.constant 0 : index
    %c0_0 = arith.constant 0 : index
    %2 = vector.load %arg1[%c0, %c0_0] : memref<128x4xi32, #tpu.memory_space<vmem>>, vector<128x1xi32>
    %3 = vector.broadcast %2 : vector<128x1xi32> to vector<128x32xi32>
    %4 = arith.cmpi eq, %3, %0 : vector<128x32xi32>
    %5 = arith.extui %4 : vector<128x32xi1> to vector<128x32xi32>
    %6 = arith.sitofp %5 : vector<128x32xi32> to vector<128x32xf32>
    %7 = arith.addf %1, %6 : vector<128x32xf32>
    %c0_1 = arith.constant 0 : index
    %c1 = arith.constant 1 : index
    %8 = vector.load %arg1[%c0_1, %c1] : memref<128x4xi32, #tpu.memory_space<vmem>>, vector<128x1xi32>
    %9 = vector.broadcast %8 : vector<128x1xi32> to vector<128x32xi32>
    %10 = arith.cmpi eq, %9, %0 : vector<128x32xi32>
    %11 = arith.extui %10 : vector<128x32xi1> to vector<128x32xi32>
    %12 = arith.sitofp %11 : vector<128x32xi32> to vector<128x32xf32>
    %13 = arith.addf %7, %12 : vector<128x32xf32>
    %c0_2 = arith.constant 0 : index
    %c2 = arith.constant 2 : index
    %14 = vector.load %arg1[%c0_2, %c2] : memref<128x4xi32, #tpu.memory_space<vmem>>, vector<128x1xi32>
    %15 = vector.broadcast %14 : vector<128x1xi32> to vector<128x32xi32>
    %16 = arith.cmpi eq, %15, %0 : vector<128x32xi32>
    %17 = arith.extui %16 : vector<128x32xi1> to vector<128x32xi32>
    %18 = arith.sitofp %17 : vector<128x32xi32> to vector<128x32xf32>
    %19 = arith.addf %13, %18 : vector<128x32xf32>
    %c0_3 = arith.constant 0 : index
    %c3 = arith.constant 3 : index
    %20 = vector.load %arg1[%c0_3, %c3] : memref<128x4xi32, #tpu.memory_space<vmem>>, vector<128x1xi32>
    %21 = vector.broadcast %20 : vector<128x1xi32> to vector<128x32xi32>
    %22 = arith.cmpi eq, %21, %0 : vector<128x32xi32>
    %23 = arith.extui %22 : vector<128x32xi1> to vector<128x32xi32>
    %24 = arith.sitofp %23 : vector<128x32xi32> to vector<128x32xf32>
    %25 = arith.addf %19, %24 : vector<128x32xf32>
    %c0_4 = arith.constant 0 : index
    %c0_5 = arith.constant 0 : index
    %26 = vector.load %arg2[%c0_4, %c0_5] : memref<32x128xf32, #tpu.memory_space<vmem>>, vector<32x128xf32>
    %cst_6 = arith.constant dense<0.000000e+00> : vector<128x128xf32>
    %27 = tpu.matmul %25, %26, %cst_6 {dimension_numbers = #tpu.dot_dimension_numbers<[1], [0], [0], [1], [0, 0, 1, 1], [], []>} : vector<128x32xf32>, vector<32x128xf32>, vector<128x128xf32> -> vector<128x128xf32>
    %c0_7 = arith.constant 0 : index
    %c0_8 = arith.constant 0 : index
    %28 = vector.load %arg3[%c0_7, %c0_8] : memref<128x128xf32, #tpu.memory_space<vmem>>, vector<128x128xf32>
    tpu.vector_store %arg3[%c0_7, %c0_8], %27 {strides = array<i32>} : memref<128x128xf32, #tpu.memory_space<vmem>>, vector<128x128xf32>,
    return
  }
  func.func @transform_0(%arg0: i32) -> (i32, i32) {
    %c0_i32 = arith.constant 0 : i32
    %c0_i32_0 = arith.constant 0 : i32
    return %arg0, %c0_i32 : i32, i32
  }
  func.func @transform_1(%arg0: i32) -> (i32, i32) {
    %c0_i32 = arith.constant 0 : i32
    %c0_i32_0 = arith.constant 0 : i32
    %c0_i32_1 = arith.constant 0 : i32
    return %c0_i32, %c0_i32_0 : i32, i32
  }
  func.func @transform_2(%arg0: i32) -> (i32, i32) {
    %c0_i32 = arith.constant 0 : i32
    %c0_i32_0 = arith.constant 0 : i32
    return %arg0, %c0_i32 : i32, i32
  }
}

</mosaic_0001>

<bundles_post_ra>
// kernel: tpu_custom_call.1
= control target key start
LH: loop header
LB: loop body
LE: loop exit
PB: predicated region body
PF: predicated region fallthrough
CT: control target
= control target key end

     0   :  { %7 = vsyncpa [#allocation3], 0  ;;  %s1554_s0 = inlined_call_operand.vmem [shape: s32[512,4], index: 0, kind: input, shape index: {}]   ;;  %s1555_s1 = inlined_call_operand.vmem [shape: f32[32,128], index: 1, kind: input, shape index: {}]   ;;  %s1556_s2 = inlined_call_operand.hbm [shape: f32[512,128], index: 2, kind: output, shape index: {}]  }
   0x1   :  { %9 = vsyncpa [#allocation3 + $0x1], 0  ;;  %s1086_s9 = smov 0   ;;  %s1088_s10 = smov 0  }
   0x2   :  { %s1090_s11 = smov 0   ;;  %s1092_s12 = smov 0  }
   0x3 LB: > { %s1107_s13 = sadd.s32 4294967295, %s1062_s12   ;;  %s823_s14 = sadd.s32 4294967294, %s1062_s12   ;;  %s1062_s12 = sphi %s1092_s12, %s1562_s12   ;;  %s1058_s11 = sphi %s1090_s11, %s1561_s11   ;;  %s1054_s10 = sphi %s1088_s10, %s1560_s10   ;;  %s1050_s9 = sphi %s1086_s9, %s1559_s9  }
   0x4   : > { %s1111_s15 = sadd.s32 1, %s1062_s12   ;;  %s69_s16 = sadd.s32 1, %s1058_s11 }
   0x5   : > { %s66_s17 = ssub.s32 %s1062_s12, %s1111_s15  ;;  %p79_p0 = scmp.ne.s32.totalorder %s1058_s11, %s1054_s10 }
   0x6   : > { %p67_p1 = scmp.eq.s32.totalorder %s66_s17, 0  ;;  %p80_p2 = scmp.eq.s32.totalorder %s1107_s13, 3 }
   0x7   : > { %p85_p3 = scmp.ne.s32.totalorder %s1054_s10, %s1050_s9  ;;  %p86_p4 = scmp.eq.s32.totalorder %s823_s14, 3 }
   0x8   : > { %s1122_s18 = scalar_select %p67_p1, %s1058_s11, %s69_s16  }
   0x9   : > { %p1124_p5 = por %p80_p2, %p79_p0  ;;  %p1128_p6 = por %p86_p4, %p85_p3 }
   0xa   : > { %p826_p7 = scmp.ge.s32.totalorder %s1062_s12, 1  ;;  %p116_p8 = scmp.lt.s32.totalorder %s1062_s12, 5 }
   0xc   : > { %p117_p9 = pnand %p826_p7, %p116_p8 }
   0xd   : > { %s828_s21 = sshll.u32 (!%p117_p9), %s1107_s13, 4  ;;  %s135_s6 = sand.u32 (!%p117_p9), 1, %s1054_s10  }
   0xe   : > { %120 = sbr.rel (%p117_p9) target bundleno = 462 (0x1ce), region = 28  ;;  %p139_p10 = scmp.lt.s32.totalorder (!%p117_p9), %s828_s21, 63 }
   0xf   : > { %s827_s7 = sshll.u32 (!%p117_p9), %s135_s6, 7  ;;  %s915_s14 = sshll.u32 (!%p117_p9), %s1107_s13, 7 }
  0x10   : > { %s1502_s8 = scalar_lea.vmem (!%p117_p9), [#allocation2], %s827_s7  ;;  %s746_s24 = scalar_lea.sflag (!%p117_p9), [#allocation3], %s135_s6 }
  0x11   : > { %s1020_s28 = scalar_lea.hbm (!%p117_p9), %s1556_s2, 512 }
  0x13   : > { %v1064_v0 = vmov 0   ;;  %s1564_s21 = smov (!%p139_p10, %s828_s21), 63  ;;  %v1065_v17 = vmov 1   ;;  %v1066_v18 = vmov 2   ;;  %v1067_v19 = vmov 3   ;;  %v614_v53 = vld [vmem:[%s1555_s1 + $0x18] sm:$0xff] }
  0x14   : > { %976 = vset.pattern.permute.xlu2 %v1064_v0  ;;  %975 = vset.pattern.permute.xlu1 %v1064_v0  ;;  %s829_s22 = sshll.u32 %s1564_s21, 3  ;;  %v145_v26 = vlaneseq  ;;  %v1068_v32 = vmov 0.0   ;;  %v613_v57 = vld [vmem:[%s1555_s1 + $0x10] sm:$0xff]  ;;  %s757_s21 = scalar_lea.hbm %s1556_s2, %s915_s14 }
  0x15   : > { %974 = vset.pattern.permute.xlu0 %v1064_v0  ;;  %s1138_s25 = scalar_lea.vmem %s1554_s0, %s829_s22  ;;  %916 = vmatpush.msra.mxu1 %v614_v53  ;;  %v612_v0 = vld [vmem:[%s1555_s1 + $0x8] sm:$0xff]  ;;  %s758_s22 = sshll.u32 %s1502_s8, 4  ;;  %s759_s22 = int_to_ptr.vmem [resolvable:$true] %s758_s22 }
  0x16   : > { %v1141_v1 = vld [vmem:[%s1138_s25 + $0x20] sm:$0xff]  ;;  %v1144_v2 = vld [vmem:[%s1138_s25 + $0x10] sm:$0xff]  ;;  %v1153_v4 = vld [vmem:[%s1138_s25 + $0x28] sm:$0xff]  ;;  %v1238_v30 = vand.u32 127, %v145_v26  ;;  %917 = vmatpush.msra.mxu2 %v614_v53  ;;  %676 = vmatpush.msra.mxu0 %v614_v53  ;;  %s760_s23 = sshll.u32 %s757_s21, 4  ;;  %s761_s23 = int_to_ptr.hbm [resolvable:$true] %s760_s23 }
  0x17   : > { %v1147_v3 = vld [vmem:[%s1138_s25] sm:$0xff]  ;;  %176 = vperm.xlu2 %976, %v1141_v1   ;;  %170 = vperm.xlu1 %975, %v1144_v2   ;;  %v1156_v5 = vld [vmem:[%s1138_s25 + $0x18] sm:$0xff]  ;;  %v1159_v6 = vld [vmem:[%s1138_s25 + $0x8] sm:$0xff] }
  0x18   : > { %164 = vperm.xlu0 %974, %v1147_v3   ;;  %v155_v7 = vld [vmem:[%s1138_s25 + $0x40] sm:$0xff]  ;;  %v1166_v8 = vld [vmem:[%s1138_s25 + $0x38] sm:$0xff]  ;;  %v1169_v9 = vld [vmem:[%s1138_s25 + $0x30] sm:$0xff]  ;;  %918 = vmatpush.msra.mxu3 %v614_v53 }
  0x19   : > { %v1174_v10 = vld [vmem:[%s1138_s25 + $0x58] sm:$0xff]  ;;  %v1177_v11 = vld [vmem:[%s1138_s25 + $0x50] sm:$0xff]  ;;  %v156_v12 = vld [vmem:[%s1138_s25 + $0x48] sm:$0xff]  ;;  %919 = vmatpush.msra.mxu1 %v613_v57  ;;  %920 = vmatpush.msra.mxu2 %v613_v57 }
  0x1a   : > { %v1183_v13 = vld [vmem:[%s1138_s25 + $0x70] sm:$0xff]  ;;  %v160_v14 = vld [vmem:[%s1138_s25 + $0x68] sm:$0xff]  ;;  %v159_v15 = vld [vmem:[%s1138_s25 + $0x60] sm:$0xff]  ;;  %677 = vmatpush.msra.mxu0 %v613_v57  ;;  %921 = vmatpush.msra.mxu3 %v613_v57 }
  0x1b   : > { %v1189_v16 = vld [vmem:[%s1138_s25 + $0x78] sm:$0xff]  ;;  %922 = vmatpush.msra.mxu1 %v612_v0  ;;  %923 = vmatpush.msra.mxu2 %v612_v0  ;;  %s1014_s25 = sshra.s32 %s761_s23, 4  ;;  %s1015_s25 = int_to_ptr.hbm [resolvable:$true] %s1014_s25 }
  0x1c   : > { %678 = vmatpush.msra.mxu0 %v612_v0  ;;  %924 = vmatpush.msra.mxu3 %v612_v0  ;;  %s1016_s26 = scalar_lea.hbm %s1015_s25, 128  ;;  %p1021_p0 = scmp.lt.s32.totalorder %s1015_s25, %s1556_s2 }
  0x1d   : > { %p1017_p11 = scmp.ne.s32.totalorder %s1015_s25, %s1016_s26  ;;  %p1022_p1 = scmp.lt.s32.totalorder %s1020_s28, %s1016_s26 }
  0x1f   : > { %179 = vperm.xlu2 %976, %v1153_v4   ;;  %173 = vperm.xlu1 %975, %v1156_v5   ;;  %p1018_p12 = pnand %p1017_p11, %p1124_p5  ;;  %p1023_p2 = por %p1022_p1, %p1021_p0 }
  0x20   : > { %167 = vperm.xlu0 %974, %v1159_v6  }
  0x21   : > { %p1019_p13 = pneg %p1018_p12 }
  0x23   : > { %p1024_p3 = pnand %p1023_p2, %p1019_p13 }
  0x27   : > { %188 = vperm.xlu2 %976, %v155_v7   ;;  %185 = vperm.xlu1 %975, %v1166_v8  }
  0x28   : > { %182 = vperm.xlu0 %974, %v1169_v9  }
  0x2f   : > { %197 = vperm.xlu2 %976, %v1174_v10   ;;  %194 = vperm.xlu1 %975, %v1177_v11  }
  0x30   : > { %191 = vperm.xlu0 %974, %v156_v12  }
  0x37   : > { %206 = vperm.xlu2 %976, %v1183_v13   ;;  %203 = vperm.xlu1 %975, %v160_v14  }
  0x38   : > { %200 = vperm.xlu0 %974, %v159_v15  }
  0x3f   : > { %978 = vset.pattern.permute.xlu2 %v1065_v17  ;;  %977 = vset.pattern.permute.xlu1 %v1065_v17 }
  0x40   : > { %209 = vperm.xlu0 %974, %v1189_v16   ;;  %279 = vperm.xlu2 %978, %v1159_v6  }
  0x41   : > { %276 = vperm.xlu1 %977, %v1147_v3  }
  0x48   : > { %979 = vset.pattern.permute.xlu0 %v1065_v17  ;;  %288 = vperm.xlu2 %978, %v1141_v1  }
  0x49   : > { %285 = vperm.xlu1 %977, %v1156_v5   ;;  %282 = vperm.xlu0 %979, %v1144_v2  }
  0x50   : > { %294 = vperm.xlu2 %978, %v1169_v9  }
  0x51   : > { %291 = vperm.xlu1 %977, %v1153_v4   ;;  %297 = vperm.xlu0 %979, %v1166_v8  }
  0x58   : > { %303 = vperm.xlu2 %978, %v156_v12  }
  0x59   : > { %300 = vperm.xlu1 %977, %v155_v7   ;;  %306 = vperm.xlu0 %979, %v1177_v11  }
  0x60   : > { %312 = vperm.xlu2 %978, %v159_v15  }
  0x61   : > { %309 = vperm.xlu1 %977, %v1174_v10   ;;  %315 = vperm.xlu0 %979, %v160_v14  }
  0x68   : > { %980 = vset.pattern.permute.xlu2 %v1066_v18 }
  0x69   : > { %318 = vperm.xlu1 %977, %v1183_v13   ;;  %986 = vset.pattern.permute.xlu0 %v1067_v19 }
  0x6a   : > { %412 = vperm.xlu2 %980, %v155_v7   ;;  %512 = vperm.xlu0 %986, %v1141_v1  }
  0x71   : > { %981 = vset.pattern.permute.xlu1 %v1067_v19  ;;  %v1210_v20 = vpop.permute.xlu2 %176 }
  0x72   : > { %982 = vset.pattern.permute.xlu2 %v1067_v19  ;;  %524 = vperm.xlu1 %981, %v155_v7  }
  0x73   : > { %542 = vperm.xlu0 %986, %v1183_v13   ;;  %536 = vperm.xlu2 %982, %v159_v15  }
  0x79   : > { %v1214_v21 = vpop.permute.xlu2 %179 }
  0x7a   : > { %983 = vset.pattern.permute.xlu1 %v1066_v18  ;;  %vm216_vm10 = vcmp.eq.s32.totalorder %v1214_v21, %v1238_v30 }
  0x7b   : > { %992 = vset.pattern.permute.xlu0 %v1066_v18  ;;  %984 = vset.pattern.permute.xlu2 %v1066_v18  ;;  %v835_v7 = vsel %vm216_vm10, 1.0, %v1068_v32 }
  0x7c   : > { %388 = vperm.xlu1 %983, %v1147_v3   ;;  %424 = vperm.xlu0 %992, %v159_v15  }
  0x7d   : > { %400 = vperm.xlu2 %984, %v1141_v1   ;;  %v611_v1 = vld [vmem:[%s1555_s1] sm:$0xff] }
  0x7e   : > { %925 = vmatpush.msra.mxu1 %v611_v1  ;;  %926 = vmatpush.msra.mxu2 %v611_v1 }
  0x7f   : > { %679 = vmatpush.msra.mxu0 %v611_v1  ;;  %927 = vmatpush.msra.mxu3 %v611_v1 }
  0x81   : > { %v1221_v22 = vpop.permute.xlu2 %188 }
  0x84   : > { %427 = vperm.xlu1 %983, %v160_v14   ;;  %415 = vperm.xlu0 %992, %v156_v12  }
  0x85   : > { %985 = vset.pattern.permute.xlu2 %v1067_v19 }
  0x86   : > { %500 = vperm.xlu2 %985, %v1147_v3  }
  0x89   : > { %v1225_v23 = vpop.permute.xlu2 %197  ;;  %v1227_v24 = vpop.permute.xlu1 %170 }
  0x8a   : > { %v1229_v25 = vpop.permute.xlu0 %164  ;;  %vm213_vm6 = vcmp.eq.s32.totalorder %v1227_v24, %v1238_v30  ;;  %vm222_vm14 = vcmp.eq.s32.totalorder %v1225_v23, %v1238_v30 }
  0x8b   : > { %v832_v58 = vsel %vm213_vm6, 1.0, %v1068_v32  ;;  %vm615_vm6 = vcmask 261120  }
  0x8c   : > { %987 = vset.pattern.permute.xlu1 %v1067_v19  ;;  %418 = vperm.xlu0 %992, %v1177_v11  }
  0x8d   : > { %527 = vperm.xlu1 %987, %v156_v12  }
  0x8e   : > { %539 = vperm.xlu2 %985, %v160_v14  }
  0x91   : > { %v1233_v27 = vpop.permute.xlu2 %206  ;;  %v1235_v28 = vpop.permute.xlu1 %173 }
  0x92   : > { %v168_v29 = vpop.permute.xlu0 %167  ;;  %vm214_vm7 = vcmp.eq.s32.totalorder %v1235_v28, %v1238_v30 }
  0x93   : > { %vm212_vm0 = vcmp.eq.s32.totalorder %v168_v29, %v1238_v30  ;;  %v833_v59 = vsel %vm214_vm7, 1.0, %v1068_v32 }
  0x94   : > { %433 = vperm.xlu0 %992, %v1189_v16   ;;  %v831_v33 = vsel %vm212_vm0, 1.0, %v1068_v32 }
  0x95   : > { %988 = vset.pattern.permute.xlu1 %v1066_v18 }
  0x96   : > { %989 = vset.pattern.permute.xlu2 %v1066_v18  ;;  %391 = vperm.xlu1 %988, %v1159_v6  }
  0x97   : > { %403 = vperm.xlu2 %989, %v1153_v4  }
  0x99   : > { %v1245_v31 = vpop.permute.xlu1 %185 }
  0x9a   : > { %v280_v34 = vpop.permute.xlu2 %279  ;;  %v183_v35 = vpop.permute.xlu0 %182  ;;  %vm218_vm11 = vcmp.eq.s32.totalorder %v1245_v31, %v1238_v30 }
  0x9b   : > { %vm324_vm1 = vcmp.eq.s32.totalorder %v280_v34, %v1238_v30  ;;  %vm217_vm2 = vcmp.eq.s32.totalorder %v183_v35, %v1238_v30 }
  0x9c   : > { %v847_v36 = vsel %vm324_vm1, 1.0, %v1068_v32  ;;  %397 = vperm.xlu0 %992, %v1156_v5   ;;  %v836_v42 = vsel %vm217_vm2, 1.0, %v1068_v32  ;;  %vm215_vm1 = vcmp.eq.s32.totalorder %v1210_v20, %v1238_v30 }
  0x9d   : > { %v1251_v37 = vadd.f32 %v847_v36, %v831_v33 }
  0x9e   : > { %430 = vperm.xlu1 %988, %v1183_v13  }
  0x9f   : > { %990 = vset.pattern.permute.xlu2 %v1067_v19 }
  0xa0   : > { %503 = vperm.xlu2 %990, %v1159_v6  }
  0xa1   : > { %v1256_v38 = vpop.permute.xlu1 %194 }
  0xa2   : > { %v1258_v39 = vpop.permute.xlu2 %288  ;;  %v192_v40 = vpop.permute.xlu0 %191 }
  0xa3   : > { %vm220_vm4 = vcmp.eq.s32.totalorder %v192_v40, %v1238_v30  ;;  %vm327_vm0 = vcmp.eq.s32.totalorder %v1258_v39, %v1238_v30 }
  0xa4   : > { %999 = vset.pattern.permute.xlu0 %v1067_v19  ;;  %v839_v47 = vsel %vm220_vm4, 1.0, %v1068_v32  ;;  %vm219_vm4 = vcmp.eq.s32.totalorder %v1221_v22, %v1238_v30 }
  0xa5   : > { %521 = vperm.xlu0 %999, %v1166_v8   ;;  %v838_v35 = vsel %vm219_vm4, 1.0, %v1068_v32 }
  0xa6   : > { %991 = vset.pattern.permute.xlu1 %v1067_v19 }
  0xa7   : > { %515 = vperm.xlu1 %991, %v1153_v4  }
  0xa8   : > { %530 = vperm.xlu2 %990, %v1177_v11   ;;  %v837_v11 = vsel %vm218_vm11, 1.0, %v1068_v32 }
  0xa9   : > { %v1266_v41 = vpop.permute.xlu1 %203 }
  0xaa   : > { %v295_v43 = vpop.permute.xlu2 %294  ;;  %v1269_v44 = vpop.permute.xlu0 %200 }
  0xab   : > { %vm329_vm3 = vcmp.eq.s32.totalorder %v295_v43, %v1238_v30  ;;  %vm223_vm11 = vcmp.eq.s32.totalorder %v1269_v44, %v1238_v30 }
  0xac   : > { %v852_v45 = vsel %vm329_vm3, 1.0, %v1068_v32 }
  0xad   : > { %v1273_v46 = vadd.f32 %v852_v45, %v836_v42 }
  0xaf   : > { %993 = vset.pattern.permute.xlu1 %v1065_v17 }
  0xb0   : > { %994 = vset.pattern.permute.xlu2 %v1066_v18  ;;  %321 = vperm.xlu1 %993, %v1189_v16  }
  0xb1   : > { %394 = vperm.xlu2 %994, %v1144_v2  }
  0xb2   : > { %v304_v48 = vpop.permute.xlu2 %303  ;;  %v1281_v49 = vpop.permute.xlu0 %209 }
  0xb3   : > { %vm332_vm5 = vcmp.eq.s32.totalorder %v304_v48, %v1238_v30  ;;  %v1284_v50 = vpop.permute.xlu1 %276 }
  0xb4   : > { %v855_v51 = vsel %vm332_vm5, 1.0, %v1068_v32  ;;  %vm323_vm10 = vcmp.eq.s32.totalorder %v1284_v50, %v1238_v30 }
  0xb5   : > { %v1287_v52 = vadd.f32 %v855_v51, %v839_v47  ;;  %v846_v53 = vsel %vm323_vm10, 1.0, %v1068_v32 }
  0xb8   : > { %995 = vset.pattern.permute.xlu1 %v1066_v18 }
  0xb9   : > { %421 = vperm.xlu2 %994, %v1174_v10   ;;  %406 = vperm.xlu1 %995, %v1169_v9  }
  0xba   : > { %v1299_v56 = vpop.permute.xlu2 %312 }
  0xbb   : > { %v286_v54 = vpop.permute.xlu1 %285  ;;  %v283_v55 = vpop.permute.xlu0 %282 }
  0xbc   : > { %vm326_vm8 = vcmp.eq.s32.totalorder %v286_v54, %v1238_v30  ;;  %vm325_vm9 = vcmp.eq.s32.totalorder %v283_v55, %v1238_v30  ;;  %v842_v54 = vsel %vm223_vm11, 1.0, %v1068_v32 }
  0xbd   : > { %v849_v60 = vsel %vm326_vm8, 1.0, %v1068_v32  ;;  %v848_v61 = vsel %vm325_vm9, 1.0, %v1068_v32  ;;  %vm211_vm9 = vcmp.eq.s32.totalorder %v1229_v25, %v1238_v30 }
  0xbe   : > { %v1310_v62 = vadd.f32 %v849_v60, %v833_v59  ;;  %v1312_v63 = vadd.f32 %v848_v61, %v832_v58  ;;  %v830_v51 = vsel %vm211_vm9, 1.0, %v1068_v32  ;;  %vm221_vm9 = vcmp.eq.s32.totalorder %v1256_v38, %v1238_v30 }
  0xbf   : > { %v371_v50 = vadd.f32 %v846_v53, %v830_v51 }
  0xc1   : > { %997 = vset.pattern.permute.xlu2 %v1067_v19  ;;  %996 = vset.pattern.permute.xlu1 %v1067_v19 }
  0xc2   : > { %518 = vperm.xlu2 %997, %v1169_v9   ;;  %506 = vperm.xlu1 %996, %v1144_v2  }
  0xc3   : > { %v292_v3 = vpop.permute.xlu1 %291  ;;  %v298_v4 = vpop.permute.xlu0 %297 }
  0xc4   : > { %vm328_vm12 = vcmp.eq.s32.totalorder %v292_v3, %v1238_v30  ;;  %vm330_vm13 = vcmp.eq.s32.totalorder %v298_v4, %v1238_v30  ;;  %v413_v6 = vpop.permute.xlu2 %412 }
  0xc5   : > { %v851_v12 = vsel %vm328_vm12, 1.0, %v1068_v32  ;;  %v853_v9 = vsel %vm330_vm13, 1.0, %v1068_v32  ;;  %vm443_vm7 = vcmp.eq.s32.totalorder %v413_v6, %v1238_v30  ;;  %vm335_vm12 = vcmp.eq.s32.totalorder %v1299_v56, %v1238_v30 }
  0xc6   : > { %v1334_v2 = vadd.f32 %v851_v12, %v835_v7  ;;  %v1336_v13 = vadd.f32 %v853_v9, %v837_v11  ;;  %v870_v40 = vsel %vm443_vm7, 1.0, %v1068_v32  ;;  %v858_v25 = vsel %vm335_vm12, 1.0, %v1068_v32 }
  0xc7   : > { %v383_v58 = vadd.f32 %v858_v25, %v842_v54 }
  0xca   : > { %545 = vperm.xlu2 %997, %v1189_v16   ;;  %533 = vperm.xlu1 %996, %v1174_v10   ;;  %v841_v10 = vsel %vm222_vm14, 1.0, %v1068_v32 }
  0xcb   : > { %v301_v14 = vpop.permute.xlu1 %300  ;;  %v1340_v15 = vpop.permute.xlu0 %306 }
  0xcc   : > { %vm331_vm3 = vcmp.eq.s32.totalorder %v301_v14, %v1238_v30  ;;  %vm333_vm7 = vcmp.eq.s32.totalorder %v1340_v15, %v1238_v30  ;;  %v840_v15 = vsel %vm221_vm9, 1.0, %v1068_v32 }
  0xcd   : > { %v1342_v17 = vpop.permute.xlu2 %536  ;;  %v854_v20 = vsel %vm331_vm3, 1.0, %v1068_v32 }
  0xce   : > { %v379_v39 = vadd.f32 %v854_v20, %v838_v35  ;;  %vm559_vm14 = vcmp.eq.s32.totalorder %v1342_v17, %v1238_v30 }
  0xcf   : > { %v890_v1 = vsel %vm559_vm14, 1.0, %v1068_v32 }
  0xd0   : > { %v491_v42 = vadd.f32 %v870_v40, %v379_v39 }
  0xd2   : > { %509 = vperm.xlu2 %997, %v1156_v5   ;;  %998 = vset.pattern.permute.xlu1 %v1066_v18  ;;  %v834_v18 = vsel %vm215_vm1, 1.0, %v1068_v32 }
  0xd3   : > { %409 = vperm.xlu1 %998, %v1166_v8   ;;  %v310_v19 = vpop.permute.xlu1 %309  ;;  %v1349_v21 = vpop.permute.xlu0 %315  ;;  %v850_v8 = vsel %vm327_vm0, 1.0, %v1068_v32 }
  0xd4   : > { %vm334_vm15 = vcmp.eq.s32.totalorder %v310_v19, %v1238_v30  ;;  %v375_v26 = vadd.f32 %v850_v8, %v834_v18  ;;  %vm336_vm1 = vcmp.eq.s32.totalorder %v1349_v21, %v1238_v30 }
  0xd5   : > { %v857_v16 = vsel %vm334_vm15, 1.0, %v1068_v32  ;;  %v859_v6 = vsel %vm336_vm1, 1.0, %v1068_v32 }
  0xd6   : > { %v1356_v24 = vadd.f32 %v857_v16, %v841_v10 }
  0xd7   : > { %v401_v5 = vpop.permute.xlu2 %400 }
  0xd8   : > { %vm439_vm2 = vcmp.eq.s32.totalorder %v401_v5, %v1238_v30 }
  0xd9   : > { %v866_v23 = vsel %vm439_vm2, 1.0, %v1068_v32  ;;  %vm224_vm2 = vcmp.eq.s32.totalorder %v1266_v41, %v1238_v30 }
  0xda   : > { %v487_v31 = vadd.f32 %v866_v23, %v375_v26  ;;  %v843_v7 = vsel %vm224_vm2, 1.0, %v1068_v32 }
  0xdb   : > { %v1365_v28 = vpop.permute.xlu1 %318  ;;  %v384_v9 = vadd.f32 %v859_v6, %v843_v7 }
  0xdc   : > { %v513_v29 = vpop.permute.xlu0 %512  ;;  %vm337_vm14 = vcmp.eq.s32.totalorder %v1365_v28, %v1238_v30 }
  0xdd   : > { %vm551_vm5 = vcmp.eq.s32.totalorder %v513_v29, %v1238_v30  ;;  %v856_v29 = vsel %vm333_vm7, 1.0, %v1068_v32 }
  0xde   : > { %v882_v33 = vsel %vm551_vm5, 1.0, %v1068_v32 }
  0xdf   : > { %v599_v34 = vadd.f32 %v882_v33, %v487_v31  ;;  %v381_v31 = vadd.f32 %v856_v29, %v840_v15 }
  0xe0   : > { %v501_v36 = vpop.permute.xlu2 %500 }
  0xe1   : > { %898 = vmatmul.msk.f32.vlgmr.msra.gmra.mxu1 %vm615_vm6, %v599_v34  ;;  %vm547_vm13 = vcmp.eq.s32.totalorder %v501_v36, %v1238_v30 }
  0xe2   : > { %v878_v44 = vsel %vm547_vm13, 1.0, %v1068_v32 }
  0xe4   : > { %v525_v22 = vpop.permute.xlu1 %524 }
  0xe5   : > { %vm555_vm8 = vcmp.eq.s32.totalorder %v525_v22, %v1238_v30  ;;  %v1377_v43 = vpop.permute.xlu0 %542 }
  0xe6   : > { %v886_v45 = vsel %vm555_vm8, 1.0, %v1068_v32 }
  0xe7   : > { %v603_v47 = vadd.f32 %v886_v45, %v491_v42  ;;  %v860_v42 = vsel %vm337_vm14, 1.0, %v1068_v32 }
  0xe8   : > { %v540_v48 = vpop.permute.xlu2 %539 }
  0xe9   : > { %902 = vmatmul.msk.f32.vlgmr.msra.gmra.mxu2 %vm615_vm6, %v603_v47  ;;  %vm560_vm3 = vcmp.eq.s32.totalorder %v540_v48, %v1238_v30 }
  0xea   : > { %v891_v14 = vsel %vm560_vm3, 1.0, %v1068_v32 }
  0xee   : > { %v389_v55 = vpop.permute.xlu1 %388  ;;  %v425_v57 = vpop.permute.xlu0 %424 }
  0xef   : > { %vm435_vm15 = vcmp.eq.s32.totalorder %v389_v55, %v1238_v30  ;;  %vm447_vm0 = vcmp.eq.s32.totalorder %v425_v57, %v1238_v30 }
  0xf0   : > { %v862_v56 = vsel %vm435_vm15, 1.0, %v1068_v32  ;;  %v874_v59 = vsel %vm447_vm0, 1.0, %v1068_v32  ;;  %vm225_vm15 = vcmp.eq.s32.totalorder %v1233_v27, %v1238_v30  ;;  %vm561_vm0 = vcmp.eq.s32.totalorder %v1377_v43, %v1238_v30 }
  0xf1   : > { %v483_v60 = vadd.f32 %v862_v56, %v371_v50  ;;  %v495_v61 = vadd.f32 %v874_v59, %v383_v58  ;;  %v1403_v0 = vpop.permute.xlu2 %403  ;;  %v844_v45 = vsel %vm225_vm15, 1.0, %v1068_v32  ;;  %v892_v27 = vsel %vm561_vm0, 1.0, %v1068_v32 }
  0xf2   : > { %v385_v48 = vadd.f32 %v860_v42, %v844_v45  ;;  %vm440_vm2 = vcmp.eq.s32.totalorder %v1403_v0, %v1238_v30 }
  0xf3   : > { %v595_v3 = vadd.f32 %v878_v44, %v483_v60  ;;  %v607_v4 = vadd.f32 %v890_v1, %v495_v61  ;;  %v867_v54 = vsel %vm440_vm2, 1.0, %v1068_v32 }
  0xf4   : > { %v488_v50 = vadd.f32 %v867_v54, %v1334_v2 }
  0xf5   : > { %894 = vmatmul.msk.f32.vlgmr.msra.gmra.mxu0 %vm615_vm6, %v595_v3  ;;  %906 = vmatmul.msk.f32.vlgmr.msra.gmra.mxu3 %vm615_vm6, %v607_v4 }
  0xf6   : > { %v428_v11 = vpop.permute.xlu1 %427  ;;  %v416_v12 = vpop.permute.xlu0 %415 }
  0xf7   : > { %vm448_vm4 = vcmp.eq.s32.totalorder %v428_v11, %v1238_v30  ;;  %vm444_vm5 = vcmp.eq.s32.totalorder %v416_v12, %v1238_v30 }
  0xf8   : > { %v875_v41 = vsel %vm448_vm4, 1.0, %v1068_v32  ;;  %v871_v10 = vsel %vm444_vm5, 1.0, %v1068_v32  ;;  %vm226_vm4 = vcmp.eq.s32.totalorder %v1281_v49, %v1238_v30 }
  0xf9   : > { %v496_v17 = vadd.f32 %v875_v41, %v384_v9  ;;  %v492_v8 = vadd.f32 %v871_v10, %v1287_v52  ;;  %v845_v56 = vsel %vm226_vm4, 1.0, %v1068_v32 }
  0xfa   : > { %v504_v19 = vpop.permute.xlu2 %503 }
  0xfb   : > { %v608_v21 = vadd.f32 %v891_v14, %v496_v17  ;;  %vm548_vm12 = vcmp.eq.s32.totalorder %v504_v19, %v1238_v30 }
  0xfc   : > { %v879_v34 = vsel %vm548_vm12, 1.0, %v1068_v32 }
  0xfd   : > { %907 = vmatmul.msk.f32.gmra.mxu3 %vm615_vm6, %v608_v21 }
  0xfe   : > { %v419_v16 = vpop.permute.xlu0 %418 }
  0xff   : > { %v528_v5 = vpop.permute.xlu1 %527  ;;  %vm445_vm10 = vcmp.eq.s32.totalorder %v419_v16, %v1238_v30 }
 0x100   : > { %vm556_vm8 = vcmp.eq.s32.totalorder %v528_v5, %v1238_v30  ;;  %v872_v52 = vsel %vm445_vm10, 1.0, %v1068_v32 }
 0x101   : > { %v887_v18 = vsel %vm556_vm8, 1.0, %v1068_v32  ;;  %v493_v38 = vadd.f32 %v872_v52, %v381_v31 }
 0x102   : > { %v604_v23 = vadd.f32 %v887_v18, %v492_v8  ;;  %v531_v26 = vpop.permute.xlu2 %530 }
 0x103   : > { %vm557_vm11 = vcmp.eq.s32.totalorder %v531_v26, %v1238_v30 }
 0x104   : > { %903 = vmatmul.msk.f32.gmra.mxu2 %vm615_vm6, %v604_v23  ;;  %v888_v20 = vsel %vm557_vm11, 1.0, %v1068_v32 }
 0x105   : > { %v605_v35 = vadd.f32 %v888_v20, %v493_v38 }
 0x106   : > { %v434_v58 = vpop.permute.xlu0 %433 }
 0x107   : > { %vm450_vm5 = vcmp.eq.s32.totalorder %v434_v58, %v1238_v30 }
 0x108   : > { %v392_v33 = vpop.permute.xlu1 %391  ;;  %v877_v61 = vsel %vm450_vm5, 1.0, %v1068_v32 }
 0x109   : > { %vm436_vm13 = vcmp.eq.s32.totalorder %v392_v33, %v1238_v30 }
 0x10a   : > { %v863_v36 = vsel %vm436_vm13, 1.0, %v1068_v32 }
 0x10b   : > { %v484_v39 = vadd.f32 %v863_v36, %v1251_v37  ;;  %v395_v40 = vpop.permute.xlu2 %394 }
 0x10c   : > { %904 = vmatmul.msk.f32.gmra.mxu2 %vm615_vm6, %v605_v35  ;;  %vm437_vm11 = vcmp.eq.s32.totalorder %v395_v40, %v1238_v30 }
 0x10d   : > { %v596_v22 = vadd.f32 %v879_v34, %v484_v39  ;;  %v864_v12 = vsel %vm437_vm11, 1.0, %v1068_v32 }
 0x10e   : > { %v398_v9 = vpop.permute.xlu0 %397  ;;  %v485_v41 = vadd.f32 %v864_v12, %v1312_v63 }
 0x10f   : > { %895 = vmatmul.msk.f32.gmra.mxu0 %vm615_vm6, %v596_v22  ;;  %vm438_vm13 = vcmp.eq.s32.totalorder %v398_v9, %v1238_v30 }
 0x110   : > { %v431_v47 = vpop.permute.xlu1 %430  ;;  %v865_v21 = vsel %vm438_vm13, 1.0, %v1068_v32 }
 0x111   : > { %vm449_vm1 = vcmp.eq.s32.totalorder %v431_v47, %v1238_v30  ;;  %v486_v5 = vadd.f32 %v865_v21, %v1310_v62 }
 0x112   : > { %v876_v37 = vsel %vm449_vm1, 1.0, %v1068_v32 }
 0x113   : > { %v497_v28 = vadd.f32 %v876_v37, %v385_v48  ;;  %v422_v51 = vpop.permute.xlu2 %421 }
 0x114   : > { %vm446_vm14 = vcmp.eq.s32.totalorder %v422_v51, %v1238_v30 }
 0x115   : > { %v609_v53 = vadd.f32 %v892_v27, %v497_v28  ;;  %v873_v10 = vsel %vm446_vm14, 1.0, %v1068_v32 }
 0x116   : > { %v494_v8 = vadd.f32 %v873_v10, %v1356_v24 }
 0x117   : > { %908 = vmatmul.msk.f32.gmra.mxu3 %vm615_vm6, %v609_v53  ;;  %v522_v29 = vpop.permute.xlu0 %521 }
 0x118   : > { %vm554_vm1 = vcmp.eq.s32.totalorder %v522_v29, %v1238_v30 }
 0x119   : > { %v516_v25 = vpop.permute.xlu1 %515  ;;  %v885_v24 = vsel %vm554_vm1, 1.0, %v1068_v32 }
 0x11a   : > { %vm552_vm3 = vcmp.eq.s32.totalorder %v516_v25, %v1238_v30 }
 0x11b   : > { %v883_v43 = vsel %vm552_vm3, 1.0, %v1068_v32 }
 0x11c   : > { %v600_v55 = vadd.f32 %v883_v43, %v488_v50  ;;  %v519_v57 = vpop.permute.xlu2 %518 }
 0x11d   : > { %vm553_vm9 = vcmp.eq.s32.totalorder %v519_v57, %v1238_v30 }
 0x11e   : > { %899 = vmatmul.msk.f32.gmra.mxu1 %vm615_vm6, %v600_v55  ;;  %v884_v4 = vsel %vm553_vm9, 1.0, %v1068_v32 }
 0x122   : > { %v322_v44 = vpop.permute.xlu1 %321 }
 0x123   : > { %vm338_vm7 = vcmp.eq.s32.totalorder %v322_v44, %v1238_v30 }
 0x124   : > { %v861_v2 = vsel %vm338_vm7, 1.0, %v1068_v32  ;;  %v546_v59 = vpop.permute.xlu2 %545 }
 0x125   : > { %v386_v60 = vadd.f32 %v861_v2, %v845_v56  ;;  %vm562_vm8 = vcmp.eq.s32.totalorder %v546_v59, %v1238_v30 }
 0x126   : > { %v893_v0 = vsel %vm562_vm8, 1.0, %v1068_v32 }
 0x127   : > { %v498_v1 = vadd.f32 %v877_v61, %v386_v60 }
 0x129   : > { %v610_v49 = vadd.f32 %v893_v0, %v498_v1 }
 0x12b   : > { %v407_v3 = vpop.permute.xlu1 %406  ;;  %909 = vmatmul.msk.f32.gmra.mxu3 %vm615_vm6, %v610_v49 }
 0x12c   : > { %vm441_vm10 = vcmp.eq.s32.totalorder %v407_v3, %v1238_v30  ;;  %v510_v17 = vpop.permute.xlu2 %509 }
 0x12d   : > { %v868_v6 = vsel %vm441_vm10, 1.0, %v1068_v32  ;;  %vm550_vm15 = vcmp.eq.s32.totalorder %v510_v17, %v1238_v30 }
 0x12e   : > { %v489_v7 = vadd.f32 %v868_v6, %v1273_v46  ;;  %v881_v63 = vsel %vm550_vm15, 1.0, %v1068_v32 }
 0x12f   : > { %v598_v23 = vadd.f32 %v881_v63, %v486_v5 }
 0x130   : > { %v601_v11 = vadd.f32 %v884_v4, %v489_v7 }
 0x132   : > { %900 = vmatmul.msk.f32.gmra.mxu1 %vm615_vm6, %v601_v11 }
 0x134   : > { %v507_v14 = vpop.permute.xlu1 %506 }
 0x135   : > { %vm549_vm12 = vcmp.eq.s32.totalorder %v507_v14, %v1238_v30 }
 0x136   : > { %v880_v19 = vsel %vm549_vm12, 1.0, %v1068_v32 }
 0x137   : > { %v597_v46 = vadd.f32 %v880_v19, %v485_v41 }
 0x139   : > { %896 = vmatmul.msk.f32.gmra.mxu0 %vm615_vm6, %v597_v46 }
 0x13c   : > { %v534_v16 = vpop.permute.xlu1 %533 }
 0x13d   : > { %vm558_vm0 = vcmp.eq.s32.totalorder %v534_v16, %v1238_v30 }
 0x13e   : > { %v889_v18 = vsel %vm558_vm0, 1.0, %v1068_v32 }
 0x13f   : > { %v606_v26 = vadd.f32 %v889_v18, %v494_v8 }
 0x141   : > { %897 = vmatmul.msk.f32.gmra.mxu0 %vm615_vm6, %v598_v23  ;;  %905 = vmatmul.msk.f32.gmra.mxu2 %vm615_vm6, %v606_v26 }
 0x145   : > { %v410_v15 = vpop.permute.xlu1 %409 }
 0x146   : > { %vm442_vm2 = vcmp.eq.s32.totalorder %v410_v15, %v1238_v30 }
 0x147   : > { %v869_v62 = vsel %vm442_vm2, 1.0, %v1068_v32 }
 0x148   : > { %v490_v52 = vadd.f32 %v869_v62, %v1336_v13 }
 0x14a   : > { %v602_v31 = vadd.f32 %v885_v24, %v490_v52 }
 0x14c   : > { %901 = vmatmul.msk.f32.gmra.mxu1 %vm615_vm6, %v602_v31 }
 0x15e   : > { %v693_v20 = vpop.f32.mrf.mxu1 }
 0x15f   : > { %733 = vst [vmem:[%s1502_s8 + $0x20] sm:$0xff] %v693_v20 }
 0x16c   : > { %v705_v30 = vpop.f32.mrf.mxu2 }
 0x16d   : > { %737 = vst [vmem:[%s1502_s8 + $0x40] sm:$0xff] %v705_v30 }
 0x172   : > { %v681_v32 = vpop.f32.mrf.mxu0 }
 0x173   : > { %729 = vst [vmem:[%s1502_s8] sm:$0xff] %v681_v32 }
 0x178   : > { %v717_v13 = vpop.f32.mrf.mxu3 }
 0x179   : > { %741 = vst [vmem:[%s1502_s8 + $0x60] sm:$0xff] %v717_v13 }
 0x180   : > { %v720_v38 = vpop.f32.mrf.mxu3 }
 0x181   : > { %742 = vst [vmem:[%s1502_s8 + $0x68] sm:$0xff] %v720_v38 }
 0x187   : > { %v708_v33 = vpop.f32.mrf.mxu2 }
 0x188   : > { %738 = vst [vmem:[%s1502_s8 + $0x48] sm:$0xff] %v708_v33 }
 0x18c   : > { %v684_v34 = vpop.f32.mrf.mxu0 }
 0x18d   : > { %730 = vst [vmem:[%s1502_s8 + $0x8] sm:$0xff] %v684_v34 }
 0x18f   : > { %v711_v35 = vpop.f32.mrf.mxu2 }
 0x190   : > { %739 = vst [vmem:[%s1502_s8 + $0x50] sm:$0xff] %v711_v35 }
 0x19a   : > { %v723_v36 = vpop.f32.mrf.mxu3 }
 0x19b   : > { %743 = vst [vmem:[%s1502_s8 + $0x70] sm:$0xff] %v723_v36  ;;  %v696_v39 = vpop.f32.mrf.mxu1 }
 0x19c   : > { %734 = vst [vmem:[%s1502_s8 + $0x28] sm:$0xff] %v696_v39 }
 0x1ae   : > { %v726_v40 = vpop.f32.mrf.mxu3 }
 0x1af   : > { %744 = vst [vmem:[%s1502_s8 + $0x78] sm:$0xff] %v726_v40  ;;  %v699_v22 = vpop.f32.mrf.mxu1 }
 0x1b0   : > { %735 = vst [vmem:[%s1502_s8 + $0x30] sm:$0xff] %v699_v22 }
 0x1b6   : > { %v687_v42 = vpop.f32.mrf.mxu0 }
 0x1b7   : > { %731 = vst [vmem:[%s1502_s8 + $0x10] sm:$0xff] %v687_v42 }
 0x1be   : > { %v690_v45 = vpop.f32.mrf.mxu0 }
 0x1bf   : > { %732 = vst [vmem:[%s1502_s8 + $0x18] sm:$0xff] %v690_v45 }
 0x1c4   : > { %v714_v47 = vpop.f32.mrf.mxu2 }
 0x1c5   : > { %740 = vst [vmem:[%s1502_s8 + $0x58] sm:$0xff] %v714_v47 }
 0x1c9   : > { %v702_v48 = vpop.f32.mrf.mxu1 }
 0x1ca   : > { %736 = vst [vmem:[%s1502_s8 + $0x38] sm:$0xff] %v702_v48 }
 0x1cb   : > { %1027 = shalt.err (!%p1024_p3)
}
 0x1cc   : > { %s1069_s3 = smov 128   ;;  %s1070_s4 = smov 8  }
 0x1cd   : > { %928 = dma.vmem_to_hbm [thread:$0]  (%p1124_p5), %s759_s22, 2048, %s761_s23, %s746_s24, %s1069_s3, %s1069_s3, %s1070_s4  }
 0x1ce PF: > { %p934_p4 = scmp.ge.s32.totalorder %s1062_s12, 2  ;;  %s775_s5 = sand.u32 1, %s1050_s9  }
 0x1cf   : > { %s776_s6 = scalar_lea.sflag [#allocation3], %s775_s5 }
 0x1d0   : > { %p931_p7 = pnand %p934_p4, %p1128_p6 }
 0x1d2   : > { %p932_p8 = pneg %p931_p7 }
 0x1d4   : > { %1045 = dma.done.wait (%p932_p8), %s776_s6, 2048  }
 0x1d5   : > { %1047 = vsyncadd (%p932_p8), %s776_s6, 4294965248  ;;  %p12_p9 = scmp.ge.s32.totalorder %s1111_s15, 6   ;;  %s1559_s9 = smov %s1054_s10 }
 0x1d6   : > { %s1560_s10 = smov %s1058_s11  ;;  %s1561_s11 = smov %s1122_s18 }
 0x1d7   : > { %s1562_s12 = smov %s1111_s15  ;;  %14 = sbr.rel (!%p12_p9) target bundleno = 3 (0x3), region = 63 }
 0x1dc   :  { %782 = vsyncpa [#allocation3], 1 }
 0x1dd   :  { %784 = vsyncpa [#allocation3 + $0x1], 1 }

</bundles_post_ra>
